<compile_context>
chip_gen: v5e
topology: v5e:2x2
jax: 0.10.0
libtpu: 0.0.40
codegen_flags: <defaults>
</compile_context>

<pallas_src>
import jax
import jax.numpy as jnp
from jax.experimental import pallas as pl
from jax.experimental.pallas import tpu as pltpu

# Module hyper-parameters (from the PyTorch source)
BATCH = 1          # batch_size
SEQ = 6            # sequence_length
VOCAB = 5          # input_size (embedding vocab)
EMB = 10           # embedding_size
HIDDEN = 5         # hidden_size
CLASSES = 5        # num_classes

# Packed-weight layout: everything padded to full 128-lane width; matmul RHS operands
# padded to 128 rows so the contraction dim matches the (1, 128) lane-resident h.
LANES = 128
PAD_SEQ = 8                      # output rows padded to a sublane multiple
ROW_INTAB = 0                    # rows [0, 8)    : emb_w @ W_ih^T + (b_ih + b_hh)  (VOCAB used)
ROW_WHH = 8                      # rows [8, 136)  : W_hh^T zero-padded to (128, 128)
ROW_FCW = ROW_WHH + LANES        # rows [136, 264): fc_w^T zero-padded to (128, 128)
ROW_FCB = ROW_FCW + LANES        # row 264        : fc_b  (1, 128)
PACK_ROWS = 272                  # multiple of 8
PACK_LANES = LANES


def rnn_kernel(ids_ref, w_ref, out_ref):
    """ids_ref: (SEQ,) int32 in SMEM.  w_ref: (PACK_ROWS, 128) f32 in VMEM.
    out_ref: (PAD_SEQ, 128) f32 in VMEM (lane-dense; wrapper slices to (SEQ, CLASSES))."""
    # Full-width, zero-padded weight slabs (no sub-tile slicing -> no masked loads).
    whh = w_ref[ROW_WHH:ROW_WHH + LANES, :]        # (128, 128) = W_hh^T (zero-padded)
    fcw = w_ref[ROW_FCW:ROW_FCW + LANES, :]        # (128, 128) = fc_w^T (zero-padded)
    fcb = w_ref[ROW_FCB:ROW_FCB + 1, :]            # (1, 128)   = fc_b   (zero-padded)

    # Per-step fused input contributions (bias already folded in), gathered as full rows:
    #   x_t = (emb_w @ W_ih^T)[ids[t]] + b_ih + b_hh     -> (1, 128), zero beyond HIDDEN.
    x = [w_ref[pl.ds(ids_ref[t], 1), :] for t in range(SEQ)]

    # Zero the padded output rows (they are sliced away by the wrapper).
    out_ref[SEQ:, :] = jnp.zeros((PAD_SEQ - SEQ, PACK_LANES), jnp.float32)

    # t = 0: h_0 == 0, so the recurrent term vanishes.  Padded lanes stay exactly 0
    # (tanh(0) = 0), so they never contaminate later steps.
    h = jnp.tanh(x[0])                                                       # (1, 128)
    out_ref[0:1, :] = jnp.dot(h, fcw, preferred_element_type=jnp.float32) + fcb

    # Serial recurrence: one native (1,128)x(128,128) MXU dot + one tanh per step on the
    # critical path.  The per-step FC dot is independent of the next step, so it hides
    # under the dependency chain instead of forming a tail matmul.
    for t in range(1, SEQ):
        h = jnp.tanh(x[t] + jnp.dot(h, whh, preferred_element_type=jnp.float32))
        out_ref[t:t + 1, :] = jnp.dot(h, fcw, preferred_element_type=jnp.float32) + fcb


def prepare_params(params):
    """One-time packing: fuse embedding+input projection, fold biases, transpose, and
    zero-pad everything to native (rows, 128) slabs so the kernel never masks/relayouts."""
    emb_w, w_ih, w_hh, b_ih, b_hh, fc_w, fc_b = params
    in_tab = emb_w @ w_ih.T + (b_ih + b_hh)[None, :]          # (VOCAB, HIDDEN)
    packed = jnp.zeros((PACK_ROWS, PACK_LANES), jnp.float32)
    packed = packed.at[ROW_INTAB:ROW_INTAB + VOCAB, :HIDDEN].set(in_tab)
    packed = packed.at[ROW_WHH:ROW_WHH + HIDDEN, :HIDDEN].set(w_hh.T)
    packed = packed.at[ROW_FCW:ROW_FCW + HIDDEN, :CLASSES].set(fc_w.T)
    packed = packed.at[ROW_FCB, :CLASSES].set(fc_b)
    return packed


@jax.jit
def model_forward(x, packed_w):
    """x: int32 token ids of shape (BATCH, SEQ).  Returns (BATCH*SEQ, CLASSES) logits."""
    # Clamp ids: VMEM gathers are not bounds-checked on TPU (would silently read W_hh rows).
    ids = jnp.clip(x.reshape(-1).astype(jnp.int32), 0, VOCAB - 1)            # (SEQ,)
    out = pl.pallas_call(
        rnn_kernel,
        out_shape=jax.ShapeDtypeStruct((PAD_SEQ, PACK_LANES), jnp.float32),
        in_specs=[
            pl.BlockSpec(memory_space=pltpu.MemorySpace.SMEM),   # token ids -> SMEM
            pl.BlockSpec(memory_space=pltpu.MemorySpace.VMEM),   # packed weights (one DMA)
        ],
        out_specs=pl.BlockSpec(memory_space=pltpu.MemorySpace.VMEM),
        cost_estimate=pl.CostEstimate(
            flops=2 * (SEQ - 1) * LANES * LANES + 2 * SEQ * LANES * LANES,
            transcendentals=SEQ * LANES,
            bytes_accessed=PACK_ROWS * PACK_LANES * 4 + SEQ * 4 + PAD_SEQ * PACK_LANES * 4,
        ),
    )(ids, packed_w)
    return out[:BATCH * SEQ, :CLASSES]


def init_params(key):
    """Deterministic parameter init with PyTorch-native shapes."""
    ks = jax.random.split(key, 7)
    emb_w = jax.random.normal(ks[0], (VOCAB, EMB), jnp.float32)
    k_rnn = 1.0 / jnp.sqrt(HIDDEN)
    w_ih = jax.random.uniform(ks[1], (HIDDEN, EMB), jnp.float32, -k_rnn, k_rnn)
    w_hh = jax.random.uniform(ks[2], (HIDDEN, HIDDEN), jnp.float32, -k_rnn, k_rnn)
    b_ih = jax.random.uniform(ks[3], (HIDDEN,), jnp.float32, -k_rnn, k_rnn)
    b_hh = jax.random.uniform(ks[4], (HIDDEN,), jnp.float32, -k_rnn, k_rnn)
    k_fc = 1.0 / jnp.sqrt(HIDDEN)
    fc_w = jax.random.uniform(ks[5], (CLASSES, HIDDEN), jnp.float32, -k_fc, k_fc)
    fc_b = jax.random.uniform(ks[6], (CLASSES,), jnp.float32, -k_fc, k_fc)
    return (emb_w, w_ih, w_hh, b_ih, b_hh, fc_w, fc_b)


def reference_forward(x, params):
    """Pure-JAX reference with PyTorch nn.RNN(batch_first=True) semantics."""
    emb_w, w_ih, w_hh, b_ih, b_hh, fc_w, fc_b = params
    emb = emb_w[x.reshape(-1)]                             # (SEQ, EMB)
    h = jnp.zeros((HIDDEN,), jnp.float32)
    hs = []
    for t in range(SEQ):
        h = jnp.tanh(emb[t] @ w_ih.T + b_ih + h @ w_hh.T + b_hh)
        hs.append(h)
    H = jnp.stack(hs)                                      # (SEQ, HIDDEN)
    return H @ fc_w.T + fc_b                               # (SEQ, CLASSES)


if __name__ == "__main__":
    key = jax.random.PRNGKey(0)
    k_x, k_p = jax.random.split(key)

    # Token-id input, shape (batch=1, seq=6), values in [0, input_size)
    x = jax.random.randint(k_x, (BATCH, SEQ), 0, VOCAB, dtype=jnp.int32)
    params = init_params(k_p)
    packed_w = jax.block_until_ready(prepare_params(params))   # one-time prep, not per-call

    out = model_forward(x, packed_w)
    out = jax.block_until_ready(out)

    assert out.shape == (BATCH * SEQ, CLASSES), out.shape
    assert out.dtype == jnp.float32

    ref = jax.block_until_ready(reference_forward(x, params))
    assert jnp.allclose(out, ref, rtol=1e-3, atol=1e-3), jnp.max(jnp.abs(out - ref))

    print("KERNEL_OK")
</pallas_src>

<mosaic_0001>
module attributes {stable_mosaic.version = 11 : i64} {
  func.func @rnn_kernel(%arg0: memref<6xi32, #tpu.memory_space<smem>>, %arg1: memref<272x128xf32, #tpu.memory_space<vmem>>, %arg2: memref<8x128xf32, #tpu.memory_space<vmem>>) attributes {dimension_semantics = [], scalar_prefetch = 0 : i64, scratch_operands = 0 : i64, tpu.core_type = #tpu.core_type<tc>} {
    %c8 = arith.constant 8 : index
    %c0 = arith.constant 0 : index
    %0 = vector.load %arg1[%c8, %c0] : memref<272x128xf32, #tpu.memory_space<vmem>>, vector<128x128xf32>
    %c136 = arith.constant 136 : index
    %c0_0 = arith.constant 0 : index
    %1 = vector.load %arg1[%c136, %c0_0] : memref<272x128xf32, #tpu.memory_space<vmem>>, vector<128x128xf32>
    %c264 = arith.constant 264 : index
    %c0_1 = arith.constant 0 : index
    %2 = vector.load %arg1[%c264, %c0_1] : memref<272x128xf32, #tpu.memory_space<vmem>>, vector<1x128xf32>
    %c0_2 = arith.constant 0 : index
    %3 = memref.load %arg0[%c0_2] : memref<6xi32, #tpu.memory_space<smem>>
    %4 = arith.index_cast %3 : i32 to index
    %c0_3 = arith.constant 0 : index
    %5 = vector.load %arg1[%4, %c0_3] : memref<272x128xf32, #tpu.memory_space<vmem>>, vector<1x128xf32>
    %c1 = arith.constant 1 : index
    %6 = memref.load %arg0[%c1] : memref<6xi32, #tpu.memory_space<smem>>
    %7 = arith.index_cast %6 : i32 to index
    %c0_4 = arith.constant 0 : index
    %8 = vector.load %arg1[%7, %c0_4] : memref<272x128xf32, #tpu.memory_space<vmem>>, vector<1x128xf32>
    %c2 = arith.constant 2 : index
    %9 = memref.load %arg0[%c2] : memref<6xi32, #tpu.memory_space<smem>>
    %10 = arith.index_cast %9 : i32 to index
    %c0_5 = arith.constant 0 : index
    %11 = vector.load %arg1[%10, %c0_5] : memref<272x128xf32, #tpu.memory_space<vmem>>, vector<1x128xf32>
    %c3 = arith.constant 3 : index
    %12 = memref.load %arg0[%c3] : memref<6xi32, #tpu.memory_space<smem>>
    %13 = arith.index_cast %12 : i32 to index
    %c0_6 = arith.constant 0 : index
    %14 = vector.load %arg1[%13, %c0_6] : memref<272x128xf32, #tpu.memory_space<vmem>>, vector<1x128xf32>
    %c4 = arith.constant 4 : index
    %15 = memref.load %arg0[%c4] : memref<6xi32, #tpu.memory_space<smem>>
    %16 = arith.index_cast %15 : i32 to index
    %c0_7 = arith.constant 0 : index
    %17 = vector.load %arg1[%16, %c0_7] : memref<272x128xf32, #tpu.memory_space<vmem>>, vector<1x128xf32>
    %c5 = arith.constant 5 : index
    %18 = memref.load %arg0[%c5] : memref<6xi32, #tpu.memory_space<smem>>
    %19 = arith.index_cast %18 : i32 to index
    %c0_8 = arith.constant 0 : index
    %20 = vector.load %arg1[%19, %c0_8] : memref<272x128xf32, #tpu.memory_space<vmem>>, vector<1x128xf32>
    %cst = arith.constant 0.000000e+00 : f32
    %21 = vector.broadcast %cst : f32 to vector<2x128xf32>
    %c6 = arith.constant 6 : index
    %c0_9 = arith.constant 0 : index
    %22 = vector.load %arg2[%c6, %c0_9] : memref<8x128xf32, #tpu.memory_space<vmem>>, vector<2x128xf32>
    tpu.vector_store %arg2[%c6, %c0_9], %21 {strides = array<i32>} : memref<8x128xf32, #tpu.memory_space<vmem>>, vector<2x128xf32>,
    %23 = math.tanh %5 : vector<1x128xf32>
    %cst_10 = arith.constant dense<0.000000e+00> : vector<1x128xf32>
    %24 = tpu.matmul %23, %1, %cst_10 {dimension_numbers = #tpu.dot_dimension_numbers<[1], [0], [0], [1], [0, 0, 1, 1], [], []>} : vector<1x128xf32>, vector<128x128xf32>, vector<1x128xf32> -> vector<1x128xf32>
    %25 = arith.addf %24, %2 : vector<1x128xf32>
    %c0_11 = arith.constant 0 : index
    %c0_12 = arith.constant 0 : index
    %26 = vector.load %arg2[%c0_11, %c0_12] : memref<8x128xf32, #tpu.memory_space<vmem>>, vector<1x128xf32>
    tpu.vector_store %arg2[%c0_11, %c0_12], %25 {strides = array<i32>} : memref<8x128xf32, #tpu.memory_space<vmem>>, vector<1x128xf32>,
    %cst_13 = arith.constant dense<0.000000e+00> : vector<1x128xf32>
    %27 = tpu.matmul %23, %0, %cst_13 {dimension_numbers = #tpu.dot_dimension_numbers<[1], [0], [0], [1], [0, 0, 1, 1], [], []>} : vector<1x128xf32>, vector<128x128xf32>, vector<1x128xf32> -> vector<1x128xf32>
    %28 = arith.addf %8, %27 : vector<1x128xf32>
    %29 = math.tanh %28 : vector<1x128xf32>
    %cst_14 = arith.constant dense<0.000000e+00> : vector<1x128xf32>
    %30 = tpu.matmul %29, %1, %cst_14 {dimension_numbers = #tpu.dot_dimension_numbers<[1], [0], [0], [1], [0, 0, 1, 1], [], []>} : vector<1x128xf32>, vector<128x128xf32>, vector<1x128xf32> -> vector<1x128xf32>
    %31 = arith.addf %30, %2 : vector<1x128xf32>
    %c1_15 = arith.constant 1 : index
    %c0_16 = arith.constant 0 : index
    %32 = vector.load %arg2[%c1_15, %c0_16] : memref<8x128xf32, #tpu.memory_space<vmem>>, vector<1x128xf32>
    tpu.vector_store %arg2[%c1_15, %c0_16], %31 {strides = array<i32>} : memref<8x128xf32, #tpu.memory_space<vmem>>, vector<1x128xf32>,
    %cst_17 = arith.constant dense<0.000000e+00> : vector<1x128xf32>
    %33 = tpu.matmul %29, %0, %cst_17 {dimension_numbers = #tpu.dot_dimension_numbers<[1], [0], [0], [1], [0, 0, 1, 1], [], []>} : vector<1x128xf32>, vector<128x128xf32>, vector<1x128xf32> -> vector<1x128xf32>
    %34 = arith.addf %11, %33 : vector<1x128xf32>
    %35 = math.tanh %34 : vector<1x128xf32>
    %cst_18 = arith.constant dense<0.000000e+00> : vector<1x128xf32>
    %36 = tpu.matmul %35, %1, %cst_18 {dimension_numbers = #tpu.dot_dimension_numbers<[1], [0], [0], [1], [0, 0, 1, 1], [], []>} : vector<1x128xf32>, vector<128x128xf32>, vector<1x128xf32> -> vector<1x128xf32>
    %37 = arith.addf %36, %2 : vector<1x128xf32>
    %c2_19 = arith.constant 2 : index
    %c0_20 = arith.constant 0 : index
    %38 = vector.load %arg2[%c2_19, %c0_20] : memref<8x128xf32, #tpu.memory_space<vmem>>, vector<1x128xf32>
    tpu.vector_store %arg2[%c2_19, %c0_20], %37 {strides = array<i32>} : memref<8x128xf32, #tpu.memory_space<vmem>>, vector<1x128xf32>,
    %cst_21 = arith.constant dense<0.000000e+00> : vector<1x128xf32>
    %39 = tpu.matmul %35, %0, %cst_21 {dimension_numbers = #tpu.dot_dimension_numbers<[1], [0], [0], [1], [0, 0, 1, 1], [], []>} : vector<1x128xf32>, vector<128x128xf32>, vector<1x128xf32> -> vector<1x128xf32>
    %40 = arith.addf %14, %39 : vector<1x128xf32>
    %41 = math.tanh %40 : vector<1x128xf32>
    %cst_22 = arith.constant dense<0.000000e+00> : vector<1x128xf32>
    %42 = tpu.matmul %41, %1, %cst_22 {dimension_numbers = #tpu.dot_dimension_numbers<[1], [0], [0], [1], [0, 0, 1, 1], [], []>} : vector<1x128xf32>, vector<128x128xf32>, vector<1x128xf32> -> vector<1x128xf32>
    %43 = arith.addf %42, %2 : vector<1x128xf32>
    %c3_23 = arith.constant 3 : index
    %c0_24 = arith.constant 0 : index
    %44 = vector.load %arg2[%c3_23, %c0_24] : memref<8x128xf32, #tpu.memory_space<vmem>>, vector<1x128xf32>
    tpu.vector_store %arg2[%c3_23, %c0_24], %43 {strides = array<i32>} : memref<8x128xf32, #tpu.memory_space<vmem>>, vector<1x128xf32>,
    %cst_25 = arith.constant dense<0.000000e+00> : vector<1x128xf32>
    %45 = tpu.matmul %41, %0, %cst_25 {dimension_numbers = #tpu.dot_dimension_numbers<[1], [0], [0], [1], [0, 0, 1, 1], [], []>} : vector<1x128xf32>, vector<128x128xf32>, vector<1x128xf32> -> vector<1x128xf32>
    %46 = arith.addf %17, %45 : vector<1x128xf32>
    %47 = math.tanh %46 : vector<1x128xf32>
    %cst_26 = arith.constant dense<0.000000e+00> : vector<1x128xf32>
    %48 = tpu.matmul %47, %1, %cst_26 {dimension_numbers = #tpu.dot_dimension_numbers<[1], [0], [0], [1], [0, 0, 1, 1], [], []>} : vector<1x128xf32>, vector<128x128xf32>, vector<1x128xf32> -> vector<1x128xf32>
    %49 = arith.addf %48, %2 : vector<1x128xf32>
    %c4_27 = arith.constant 4 : index
    %c0_28 = arith.constant 0 : index
    %50 = vector.load %arg2[%c4_27, %c0_28] : memref<8x128xf32, #tpu.memory_space<vmem>>, vector<1x128xf32>
    tpu.vector_store %arg2[%c4_27, %c0_28], %49 {strides = array<i32>} : memref<8x128xf32, #tpu.memory_space<vmem>>, vector<1x128xf32>,
    %cst_29 = arith.constant dense<0.000000e+00> : vector<1x128xf32>
    %51 = tpu.matmul %47, %0, %cst_29 {dimension_numbers = #tpu.dot_dimension_numbers<[1], [0], [0], [1], [0, 0, 1, 1], [], []>} : vector<1x128xf32>, vector<128x128xf32>, vector<1x128xf32> -> vector<1x128xf32>
    %52 = arith.addf %20, %51 : vector<1x128xf32>
    %53 = math.tanh %52 : vector<1x128xf32>
    %cst_30 = arith.constant dense<0.000000e+00> : vector<1x128xf32>
    %54 = tpu.matmul %53, %1, %cst_30 {dimension_numbers = #tpu.dot_dimension_numbers<[1], [0], [0], [1], [0, 0, 1, 1], [], []>} : vector<1x128xf32>, vector<128x128xf32>, vector<1x128xf32> -> vector<1x128xf32>
    %55 = arith.addf %54, %2 : vector<1x128xf32>
    %c5_31 = arith.constant 5 : index
    %c0_32 = arith.constant 0 : index
    %56 = vector.load %arg2[%c5_31, %c0_32] : memref<8x128xf32, #tpu.memory_space<vmem>>, vector<1x128xf32>
    tpu.vector_store %arg2[%c5_31, %c0_32], %55 {strides = array<i32>} : memref<8x128xf32, #tpu.memory_space<vmem>>, vector<1x128xf32>,
    return
  }
}

</mosaic_0001>

<bundles_post_ra>
// kernel: model_forward.1
= control target key start
LH: loop header
LB: loop body
LE: loop exit
PB: predicated region body
PF: predicated region fallthrough
CT: control target
= control target key end

     0   :  { %7 = vsyncpa [#allocation5], 0  ;;  %s699_s0 = inlined_call_operand.vmem [shape: s32[6], index: 0, kind: input, shape index: {}]   ;;  %s700_s1 = inlined_call_operand.hbm [shape: f32[272,128], index: 1, kind: input, shape index: {}]   ;;  %s701_s2 = inlined_call_operand.hbm [shape: f32[8,128], index: 2, kind: output, shape index: {}]  }
   0x1   :  { %8 = vsyncpa [#allocation3], 0 }
   0x2   :  { %9 = vsyncpa [#allocation4], 0  ;;  %s15_s11 = sshll.u32 %s699_s0, 4  ;;  %s23_s14 = sshll.u32 %s700_s1, 4  ;;  %s16_s11 = int_to_ptr.vmem [resolvable:$true] %s15_s11  ;;  %s24_s14 = int_to_ptr.hbm [resolvable:$true] %s23_s14 }
   0x3   :  { %s443_s15 = smov [#allocation2]   ;;  %s444_s16 = smov [#allocation6]  }
   0x4   :  { %18 = dma.vmem_to_smem %s16_s11, 16, %s443_s15, [#allocation5]  }
   0x5   :  { %s25_s17 = sshll.u32 %s444_s16, 4  ;;  %s445_s18 = smov 128   ;;  %s26_s17 = int_to_ptr.vmem [resolvable:$true] %s25_s17 }
   0x6   :  { %s446_s19 = smov 8  }
   0x7   :  { %31 = dma.hbm_to_vmem [thread:$0]  %s24_s14, 4352, %s26_s17, [#allocation3], %s445_s18, %s445_s18, %s446_s19  }
   0x8   :  { %437 = dma.done.wait [#allocation5], 16  }
   0x9   :  { %438 = vsyncadd [#allocation5], 4294967280 }
   0xa   :  { %439 = dma.done.wait [#allocation3], 4352  }
   0xb   :  { %440 = vsyncadd [#allocation3], 4294962944 }
   0xc   :  { %40 = sfence }
   0xd   :  { %v470_v0 = vld [vmem:[#allocation6 + $0x80] sm:$0xff]  ;;  %v472_v1 = vld [vmem:[#allocation6 + $0x78] sm:$0xff]  ;;  %v476_v2 = vld [vmem:[#allocation6 + $0x70] sm:$0xff]  ;;  %s501_s0 = sld [smem:[#allocation2]]  ;;  %s448_s30 = smov [#allocation7]  }
   0xe   :  { %115 = vmatpush.msra.mxu1 %v470_v0  ;;  %158 = vmatpush.msra.mxu3 %v470_v0  ;;  %v480_v3 = vld [vmem:[#allocation6 + $0x68] sm:$0xff]  ;;  %v483_v4 = vld [vmem:[#allocation6 + $0x100] sm:$0xff]  ;;  %v485_v5 = vld [vmem:[#allocation6 + $0xf8] sm:$0xff]  ;;  %s354_s20 = sld [smem:[#allocation2 + $0x1]]  ;;  %s335_s3 = sshll.u32 %s448_s30, 4  ;;  %s336_s3 = int_to_ptr.vmem [resolvable:$true] %s335_s3 }
   0xf   :  { %v488_v6 = vld [vmem:[#allocation6 + $0x60] sm:$0xff]  ;;  %137 = vmatpush.msra.mxu2 %v483_v4  ;;  %94 = vmatpush.msra.mxu0 %v483_v4  ;;  %v493_v7 = vld [vmem:[#allocation6 + $0xf0] sm:$0xff]  ;;  %v496_v8 = vld [vmem:[#allocation6 + $0x58] sm:$0xff]  ;;  %s355_s22 = sld [smem:[#allocation2 + $0x2]]  ;;  %s337_s6 = sshll.u32 %s701_s2, 4  ;;  %s338_s6 = int_to_ptr.hbm [resolvable:$true] %s337_s6 }
  0x10   :  { %116 = vmatpush.msra.mxu1 %v472_v1  ;;  %159 = vmatpush.msra.mxu3 %v472_v1  ;;  %v503_v9 = vld [vmem:[#allocation6 + $0xe8] sm:$0xff]  ;;  %v506_v10 = vld [vmem:[#allocation6 + $0x50] sm:$0xff]  ;;  %v511_v11 = vld [vmem:[#allocation6 + $0xe0] sm:$0xff]  ;;  %s356_s24 = sld [smem:[#allocation2 + $0x3]] }
  0x11   :  { %138 = vmatpush.msra.mxu2 %v485_v5  ;;  %95 = vmatpush.msra.mxu0 %v485_v5  ;;  %v514_v12 = vld [vmem:[#allocation6 + $0x48] sm:$0xff]  ;;  %v519_v13 = vld [vmem:[#allocation6 + $0xd8] sm:$0xff]  ;;  %v522_v14 = vld [vmem:[#allocation6 + $0x40] sm:$0xff]  ;;  %s357_s26 = sld [smem:[#allocation2 + $0x4]] }
  0x12   :  { %117 = vmatpush.msra.mxu1 %v476_v2  ;;  %160 = vmatpush.msra.mxu3 %v476_v2  ;;  %v527_v15 = vld [vmem:[#allocation6 + $0xd0] sm:$0xff]  ;;  %v530_v16 = vld [vmem:[#allocation6 + $0x38] sm:$0xff]  ;;  %v535_v17 = vld [vmem:[#allocation6 + $0xc8] sm:$0xff]  ;;  %s358_s28 = sld [smem:[#allocation2 + $0x5]] }
  0x13   :  { %139 = vmatpush.msra.mxu2 %v493_v7  ;;  %96 = vmatpush.msra.mxu0 %v493_v7  ;;  %v538_v18 = vld [vmem:[#allocation6 + $0x30] sm:$0xff]  ;;  %v543_v19 = vld [vmem:[#allocation6 + $0xc0] sm:$0xff]  ;;  %v546_v20 = vld [vmem:[#allocation6 + $0x28] sm:$0xff]  ;;  %s75_s1 = scalar_lea.vmem [#allocation6], %s501_s0 }
  0x14   :  { %118 = vmatpush.msra.mxu1 %v480_v3  ;;  %161 = vmatpush.msra.mxu3 %v480_v3  ;;  %v76_v21 = vld [vmem:[%s75_s1] sm:$0x1]  ;;  %v552_v22 = vld [vmem:[#allocation6 + $0xb8] sm:$0xff]  ;;  %v560_v24 = vld [vmem:[#allocation6 + $0xb0] sm:$0xff]  ;;  %s78_s21 = scalar_lea.vmem [#allocation6], %s354_s20 }
  0x15   :  { %140 = vmatpush.msra.mxu2 %v503_v9  ;;  %97 = vmatpush.msra.mxu0 %v503_v9  ;;  %v555_v23 = vld [vmem:[#allocation6 + $0x20] sm:$0xff]  ;;  %365 = vtanh.f32 %v76_v21  ;;  %v43_v25 = vld [vmem:[#allocation6 + $0x18] sm:$0xff]  ;;  %v42_v26 = vld [vmem:[#allocation6 + $0x10] sm:$0xff]  ;;  %s81_s23 = scalar_lea.vmem [#allocation6], %s355_s22 }
  0x16   :  { %119 = vmatpush.msra.mxu1 %v488_v6  ;;  %162 = vmatpush.msra.mxu3 %v488_v6  ;;  %v41_v27 = vld [vmem:[#allocation6 + $0x8] sm:$0xff]  ;;  %v615_v30 = vld [vmem:[#allocation6 + $0xa0] sm:$0xff]  ;;  %v618_v31 = vld [vmem:[#allocation6 + $0x98] sm:$0xff]  ;;  %s84_s25 = scalar_lea.vmem [#allocation6], %s356_s24 }
  0x17   :  { %141 = vmatpush.msra.mxu2 %v511_v11  ;;  %98 = vmatpush.msra.mxu0 %v511_v11  ;;  %v611_v29 = vld [vmem:[#allocation6 + $0xa8] sm:$0xff]  ;;  %v621_v32 = vld [vmem:[#allocation6 + $0x90] sm:$0xff]  ;;  %v79_v34 = vld [vmem:[%s78_s21] sm:$0x1]  ;;  %s87_s27 = scalar_lea.vmem [#allocation6], %s357_s26 }
  0x18   :  { %120 = vmatpush.msra.mxu1 %v496_v8  ;;  %163 = vmatpush.msra.mxu3 %v496_v8  ;;  %v625_v33 = vld [vmem:[#allocation6 + $0x88] sm:$0xff]  ;;  %v82_v41 = vld [vmem:[%s81_s23] sm:$0x1]  ;;  %s90_s29 = scalar_lea.vmem [#allocation6], %s358_s28 }
  0x19   :  { %142 = vmatpush.msra.mxu2 %v519_v13  ;;  %99 = vmatpush.msra.mxu0 %v519_v13  ;;  %v73_v38 = vld [vmem:[#allocation6 + $0x108] sm:$0x1]  ;;  %v85_v47 = vld [vmem:[%s84_s25] sm:$0x1] }
  0x1a   :  { %121 = vmatpush.msra.mxu1 %v506_v10  ;;  %164 = vmatpush.msra.mxu3 %v506_v10  ;;  %v88_v53 = vld [vmem:[%s87_s27] sm:$0x1] }
  0x1b   :  { %143 = vmatpush.msra.mxu2 %v527_v15  ;;  %100 = vmatpush.msra.mxu0 %v527_v15  ;;  %v569_v28 = vpop.eup %365  ;;  %v91_v59 = vld [vmem:[%s90_s29] sm:$0x1] }
  0x1c   :  { %122 = vmatpush.msra.mxu1 %v514_v12  ;;  %165 = vmatpush.msra.mxu3 %v514_v12 }
  0x1d   :  { %144 = vmatpush.msra.mxu2 %v535_v17  ;;  %101 = vmatpush.msra.mxu0 %v535_v17 }
  0x1e   :  { %123 = vmatpush.msra.mxu1 %v522_v14  ;;  %166 = vmatpush.msra.mxu3 %v522_v14 }
  0x1f   :  { %145 = vmatpush.msra.mxu2 %v543_v19  ;;  %102 = vmatpush.msra.mxu0 %v543_v19 }
  0x20   :  { %124 = vmatpush.msra.mxu1 %v530_v16  ;;  %167 = vmatpush.msra.mxu3 %v530_v16 }
  0x21   :  { %146 = vmatpush.msra.mxu2 %v552_v22  ;;  %103 = vmatpush.msra.mxu0 %v552_v22 }
  0x22   :  { %125 = vmatpush.msra.mxu1 %v538_v18  ;;  %168 = vmatpush.msra.mxu3 %v538_v18 }
  0x23   :  { %147 = vmatpush.msra.mxu2 %v560_v24  ;;  %104 = vmatpush.msra.mxu0 %v560_v24 }
  0x24   :  { %126 = vmatpush.msra.mxu1 %v546_v20  ;;  %169 = vmatpush.msra.mxu3 %v546_v20 }
  0x25   :  { %148 = vmatpush.msra.mxu2 %v611_v29  ;;  %105 = vmatpush.msra.mxu0 %v611_v29 }
  0x26   :  { %127 = vmatpush.msra.mxu1 %v555_v23  ;;  %170 = vmatpush.msra.mxu3 %v555_v23 }
  0x27   :  { %149 = vmatpush.msra.mxu2 %v615_v30  ;;  %106 = vmatpush.msra.mxu0 %v615_v30 }
  0x28   :  { %128 = vmatpush.msra.mxu1 %v43_v25  ;;  %171 = vmatpush.msra.mxu3 %v43_v25 }
  0x29   :  { %150 = vmatpush.msra.mxu2 %v618_v31  ;;  %107 = vmatpush.msra.mxu0 %v618_v31 }
  0x2a   :  { %129 = vmatpush.msra.mxu1 %v42_v26  ;;  %172 = vmatpush.msra.mxu3 %v42_v26 }
  0x2b   :  { %151 = vmatpush.msra.mxu2 %v621_v32  ;;  %108 = vmatpush.msra.mxu0 %v621_v32 }
  0x2c   :  { %130 = vmatpush.msra.mxu1 %v41_v27  ;;  %173 = vmatpush.msra.mxu3 %v41_v27 }
  0x2d   :  { %131 = vmatmul.f32.vlgmr.msra.gmra.mxu1 %v569_v28  ;;  %152 = vmatpush.msra.mxu2 %v625_v33 }
  0x2e   :  { %244 = vmatpush.msrb.mxu3 %v470_v0  ;;  %201 = vmatpush.msrb.mxu1 %v470_v0 }
  0x2f   :  { %109 = vmatpush.msra.mxu0 %v625_v33  ;;  %223 = vmatpush.msrb.mxu2 %v483_v4 }
  0x30   :  { %245 = vmatpush.msrb.mxu3 %v472_v1  ;;  %202 = vmatpush.msrb.mxu1 %v472_v1 }
  0x31   :  { %180 = vmatpush.msrb.mxu0 %v483_v4  ;;  %224 = vmatpush.msrb.mxu2 %v485_v5 }
  0x32   :  { %246 = vmatpush.msrb.mxu3 %v476_v2  ;;  %203 = vmatpush.msrb.mxu1 %v476_v2 }
  0x33   :  { %110 = vmatmul.f32.vlgmr.msra.gmra.mxu0 %v569_v28  ;;  %225 = vmatpush.msrb.mxu2 %v493_v7 }
  0x34   :  { %247 = vmatpush.msrb.mxu3 %v480_v3  ;;  %204 = vmatpush.msrb.mxu1 %v480_v3 }
  0x35   :  { %181 = vmatpush.msrb.mxu0 %v485_v5  ;;  %226 = vmatpush.msrb.mxu2 %v503_v9 }
  0x36   :  { %248 = vmatpush.msrb.mxu3 %v488_v6  ;;  %205 = vmatpush.msrb.mxu1 %v488_v6 }
  0x37   :  { %182 = vmatpush.msrb.mxu0 %v493_v7  ;;  %227 = vmatpush.msrb.mxu2 %v511_v11 }
  0x38   :  { %249 = vmatpush.msrb.mxu3 %v496_v8  ;;  %206 = vmatpush.msrb.mxu1 %v496_v8 }
  0x39   :  { %183 = vmatpush.msrb.mxu0 %v503_v9  ;;  %228 = vmatpush.msrb.mxu2 %v519_v13 }
  0x3a   :  { %250 = vmatpush.msrb.mxu3 %v506_v10  ;;  %207 = vmatpush.msrb.mxu1 %v506_v10 }
  0x3b   :  { %184 = vmatpush.msrb.mxu0 %v511_v11  ;;  %229 = vmatpush.msrb.mxu2 %v527_v15 }
  0x3c   :  { %251 = vmatpush.msrb.mxu3 %v514_v12  ;;  %208 = vmatpush.msrb.mxu1 %v514_v12 }
  0x3d   :  { %185 = vmatpush.msrb.mxu0 %v519_v13  ;;  %230 = vmatpush.msrb.mxu2 %v535_v17 }
  0x3e   :  { %252 = vmatpush.msrb.mxu3 %v522_v14  ;;  %209 = vmatpush.msrb.mxu1 %v522_v14 }
  0x3f   :  { %186 = vmatpush.msrb.mxu0 %v527_v15  ;;  %231 = vmatpush.msrb.mxu2 %v543_v19 }
  0x40   :  { %253 = vmatpush.msrb.mxu3 %v530_v16  ;;  %210 = vmatpush.msrb.mxu1 %v530_v16 }
  0x41   :  { %187 = vmatpush.msrb.mxu0 %v535_v17  ;;  %232 = vmatpush.msrb.mxu2 %v552_v22 }
  0x42   :  { %254 = vmatpush.msrb.mxu3 %v538_v18  ;;  %211 = vmatpush.msrb.mxu1 %v538_v18 }
  0x43   :  { %188 = vmatpush.msrb.mxu0 %v543_v19  ;;  %233 = vmatpush.msrb.mxu2 %v560_v24 }
  0x44   :  { %255 = vmatpush.msrb.mxu3 %v546_v20  ;;  %212 = vmatpush.msrb.mxu1 %v546_v20 }
  0x45   :  { %189 = vmatpush.msrb.mxu0 %v552_v22  ;;  %234 = vmatpush.msrb.mxu2 %v611_v29 }
  0x46   :  { %256 = vmatpush.msrb.mxu3 %v555_v23  ;;  %213 = vmatpush.msrb.mxu1 %v555_v23 }
  0x47   :  { %190 = vmatpush.msrb.mxu0 %v560_v24  ;;  %235 = vmatpush.msrb.mxu2 %v615_v30 }
  0x48   :  { %257 = vmatpush.msrb.mxu3 %v43_v25  ;;  %214 = vmatpush.msrb.mxu1 %v43_v25 }
  0x49   :  { %191 = vmatpush.msrb.mxu0 %v611_v29  ;;  %236 = vmatpush.msrb.mxu2 %v618_v31 }
  0x4a   :  { %258 = vmatpush.msrb.mxu3 %v42_v26  ;;  %215 = vmatpush.msrb.mxu1 %v42_v26 }
  0x4b   :  { %192 = vmatpush.msrb.mxu0 %v615_v30  ;;  %237 = vmatpush.msrb.mxu2 %v621_v32 }
  0x4c   :  { %259 = vmatpush.msrb.mxu3 %v41_v27  ;;  %216 = vmatpush.msrb.mxu1 %v41_v27 }
  0x4d   :  { %193 = vmatpush.msrb.mxu0 %v618_v31  ;;  %238 = vmatpush.msrb.mxu2 %v625_v33 }
  0x4e   :  { %287 = vmatpush.msra.mxu1 %v470_v0 }
  0x4f   :  { %194 = vmatpush.msrb.mxu0 %v621_v32 }
  0x50   :  { %288 = vmatpush.msra.mxu1 %v472_v1  ;;  %v447_v1 = vmov 0.0  }
  0x51   :  { %195 = vmatpush.msrb.mxu0 %v625_v33  ;;  %92 = vst [vmem:[#allocation7 + $0x6] sm:$0x3] %v447_v1 }
  0x52   :  { %289 = vmatpush.msra.mxu1 %v476_v2 }
  0x53   :  { %266 = vmatpush.msra.mxu0 %v483_v4 }
  0x54   :  { %290 = vmatpush.msra.mxu1 %v480_v3 }
  0x55   :  { %267 = vmatpush.msra.mxu0 %v485_v5 }
  0x56   :  { %291 = vmatpush.msra.mxu1 %v488_v6 }
  0x57   :  { %268 = vmatpush.msra.mxu0 %v493_v7 }
  0x58   :  { %292 = vmatpush.msra.mxu1 %v496_v8 }
  0x59   :  { %269 = vmatpush.msra.mxu0 %v503_v9 }
  0x5a   :  { %293 = vmatpush.msra.mxu1 %v506_v10 }
  0x5b   :  { %270 = vmatpush.msra.mxu0 %v511_v11 }
  0x5c   :  { %294 = vmatpush.msra.mxu1 %v514_v12 }
  0x5d   :  { %271 = vmatpush.msra.mxu0 %v519_v13 }
  0x5e   :  { %295 = vmatpush.msra.mxu1 %v522_v14 }
  0x5f   :  { %272 = vmatpush.msra.mxu0 %v527_v15 }
  0x60   :  { %296 = vmatpush.msra.mxu1 %v530_v16 }
  0x61   :  { %273 = vmatpush.msra.mxu0 %v535_v17 }
  0x62   :  { %297 = vmatpush.msra.mxu1 %v538_v18 }
  0x63   :  { %274 = vmatpush.msra.mxu0 %v543_v19 }
  0x64   :  { %298 = vmatpush.msra.mxu1 %v546_v20 }
  0x65   :  { %275 = vmatpush.msra.mxu0 %v552_v22 }
  0x66   :  { %299 = vmatpush.msra.mxu1 %v555_v23 }
  0x67   :  { %276 = vmatpush.msra.mxu0 %v560_v24 }
  0x68   :  { %300 = vmatpush.msra.mxu1 %v43_v25 }
  0x69   :  { %277 = vmatpush.msra.mxu0 %v611_v29 }
  0x6a   :  { %301 = vmatpush.msra.mxu1 %v42_v26 }
  0x6b   :  { %278 = vmatpush.msra.mxu0 %v615_v30 }
  0x6c   :  { %302 = vmatpush.msra.mxu1 %v41_v27 }
  0x6d   :  { %279 = vmatpush.msra.mxu0 %v618_v31 }
  0x6f   :  { %280 = vmatpush.msra.mxu0 %v621_v32 }
  0x71   :  { %281 = vmatpush.msra.mxu0 %v625_v33 }
  0xaa   :  { %v132_v35 = vpop.f32.mrf.mxu1 }
  0xab   :  { %v135_v36 = vadd.f32 %v132_v35, %v79_v34 }
  0xad   :  { %367 = vtanh.f32 %v135_v36 }
  0xb0   :  { %v111_v39 = vpop.f32.mrf.mxu0 }
  0xb1   :  { %v112_v40 = vadd.f32 %v111_v39, %v73_v38 }
  0xb3   :  { %v368_v37 = vpop.eup %367  ;;  %114 = vst [vmem:[#allocation7] sm:$0x1] %v112_v40 }
  0xb4   :  { %153 = vmatmul.f32.vlgmr.msra.gmra.mxu2 %v368_v37  ;;  %174 = vmatmul.f32.vlgmr.msra.gmra.mxu3 %v368_v37 }
  0xb5   :  { %309 = vmatpush.msra.mxu2 %v483_v4 }
  0xb7   :  { %310 = vmatpush.msra.mxu2 %v485_v5 }
  0xb9   :  { %311 = vmatpush.msra.mxu2 %v493_v7 }
  0xbb   :  { %312 = vmatpush.msra.mxu2 %v503_v9 }
  0xbd   :  { %313 = vmatpush.msra.mxu2 %v511_v11 }
  0xbf   :  { %314 = vmatpush.msra.mxu2 %v519_v13 }
  0xc1   :  { %315 = vmatpush.msra.mxu2 %v527_v15 }
  0xc3   :  { %316 = vmatpush.msra.mxu2 %v535_v17 }
  0xc5   :  { %317 = vmatpush.msra.mxu2 %v543_v19 }
  0xc7   :  { %318 = vmatpush.msra.mxu2 %v552_v22 }
  0xc9   :  { %319 = vmatpush.msra.mxu2 %v560_v24 }
  0xcb   :  { %320 = vmatpush.msra.mxu2 %v611_v29 }
  0xcd   :  { %321 = vmatpush.msra.mxu2 %v615_v30 }
  0xcf   :  { %322 = vmatpush.msra.mxu2 %v618_v31 }
  0xd1   :  { %323 = vmatpush.msra.mxu2 %v621_v32 }
  0xd3   :  { %324 = vmatpush.msra.mxu2 %v625_v33 }
 0x137   :  { %v154_v42 = vpop.f32.mrf.mxu2  ;;  %v175_v43 = vpop.f32.mrf.mxu3 }
 0x138   :  { %v155_v44 = vadd.f32 %v154_v42, %v73_v38  ;;  %v178_v45 = vadd.f32 %v175_v43, %v82_v41 }
 0x13a   :  { %157 = vst [vmem:[#allocation7 + $0x1] sm:$0x1] %v155_v44  ;;  %369 = vtanh.f32 %v178_v45 }
 0x140   :  { %v370_v46 = vpop.eup %369 }
 0x141   :  { %196 = vmatmul.f32.vlgmr.msrb.gmra.mxu0 %v370_v46  ;;  %217 = vmatmul.f32.vlgmr.msrb.gmra.mxu1 %v370_v46 }
 0x1be   :  { %v197_v48 = vpop.f32.mrf.mxu0  ;;  %v218_v49 = vpop.f32.mrf.mxu1 }
 0x1bf   :  { %v198_v50 = vadd.f32 %v197_v48, %v73_v38  ;;  %v221_v51 = vadd.f32 %v218_v49, %v85_v47 }
 0x1c1   :  { %200 = vst [vmem:[#allocation7 + $0x2] sm:$0x1] %v198_v50  ;;  %371 = vtanh.f32 %v221_v51 }
 0x1c7   :  { %v372_v52 = vpop.eup %371 }
 0x1c8   :  { %239 = vmatmul.f32.vlgmr.msrb.gmra.mxu2 %v372_v52  ;;  %260 = vmatmul.f32.vlgmr.msrb.gmra.mxu3 %v372_v52 }
 0x24b   :  { %v240_v54 = vpop.f32.mrf.mxu2  ;;  %v261_v55 = vpop.f32.mrf.mxu3 }
 0x24c   :  { %v241_v56 = vadd.f32 %v240_v54, %v73_v38  ;;  %v264_v57 = vadd.f32 %v261_v55, %v88_v53 }
 0x24e   :  { %243 = vst [vmem:[#allocation7 + $0x3] sm:$0x1] %v241_v56  ;;  %373 = vtanh.f32 %v264_v57 }
 0x254   :  { %v374_v58 = vpop.eup %373 }
 0x255   :  { %282 = vmatmul.f32.vlgmr.msra.gmra.mxu0 %v374_v58  ;;  %303 = vmatmul.f32.vlgmr.msra.gmra.mxu1 %v374_v58 }
 0x2d2   :  { %v283_v60 = vpop.f32.mrf.mxu0  ;;  %v304_v61 = vpop.f32.mrf.mxu1 }
 0x2d3   :  { %v284_v62 = vadd.f32 %v283_v60, %v73_v38  ;;  %v307_v63 = vadd.f32 %v304_v61, %v91_v59 }
 0x2d5   :  { %286 = vst [vmem:[#allocation7 + $0x4] sm:$0x1] %v284_v62  ;;  %375 = vtanh.f32 %v307_v63 }
 0x2db   :  { %v376_v0 = vpop.eup %375 }
 0x2dc   :  { %325 = vmatmul.f32.vlgmr.msra.gmra.mxu2 %v376_v0 }
 0x35f   :  { %v326_v2 = vpop.f32.mrf.mxu2 }
 0x360   :  { %v327_v3 = vadd.f32 %v326_v2, %v73_v38 }
 0x362   :  { %329 = vst [vmem:[#allocation7 + $0x5] sm:$0x1] %v327_v3 }
 0x363   :  { %340 = dma.vmem_to_hbm [thread:$0]  %s336_s3, 128, %s338_s6, [#allocation4]  }
 0x364   :  { %441 = dma.done.wait [#allocation4], 128  }
 0x365   :  { %442 = vsyncadd [#allocation4], 4294967168 }
 0x366   :  { %345 = vsyncpa [#allocation3], 1 }
 0x367   :  { %346 = vsyncpa [#allocation4], 1 }
 0x368   :  { %347 = vsyncpa [#allocation5], 1 }

</bundles_post_ra>
